<compile_context>
chip_gen: v7x
topology: tpu7x:2x2x1
jax: 0.10.0
libtpu: 0.0.40
codegen_flags: <defaults>
</compile_context>

<pallas_src>
import functools

import jax
import jax.numpy as jnp
from jax.experimental import pallas as pl
from jax.experimental.pallas import tpu as pltpu


def _rbf_kernel(params_ref, x_ref, zt_ref, *out_refs, emit_dist, use_mxu):
    """One (tn, tm) output tile.

    params_ref: SMEM scalar-prefetch, [gamma = -0.5/lengthscale^2, log(sigma^2)]
    x_ref:  (tn, D)  VMEM
    zt_ref: (D, tm)  VMEM  (Z transposed so tm is the lane dim)
    """
    k_ref = out_refs[0]
    d_ref = out_refs[1] if emit_dist else None

    x = x_ref[...].astype(jnp.float32)       # (tn, D)
    zt = zt_ref[...].astype(jnp.float32)     # (D, tm)

    if use_mxu:
        # Gram trick on the MXU for larger D; VALU stays mostly idle.
        xx = jnp.sum(x * x, axis=-1, keepdims=True)       # (tn, 1)   XLU
        zz = jnp.sum(zt * zt, axis=0, keepdims=True)      # (1, tm)   XLU
        xz = jax.lax.dot_general(
            x, zt, dimension_numbers=(((1,), (0,)), ((), ())),
            preferred_element_type=jnp.float32)           # (tn, tm)  MXU
        d2 = jnp.maximum(xx + zz - 2.0 * xz, 0.0)         # clamp fp round-off
    else:
        # Tiny feature dim (D <= 4): unrolled exact VPU accumulation.
        D = x.shape[1]
        d2 = jnp.zeros((x.shape[0], zt.shape[1]), jnp.float32)
        for d in range(D):
            diff = x[:, d:d + 1] - zt[d:d + 1, :]          # (tn, tm) broadcast
            d2 = d2 + diff * diff

    gamma = params_ref[0]       # -0.5 / lengthscale^2
    log_coef = params_ref[1]    # log(sigma^2)

    if emit_dist:
        d_ref[...] = jnp.sqrt(d2).astype(d_ref.dtype)      # == torch.cdist

    k_ref[...] = jnp.exp(d2 * gamma + log_coef).astype(k_ref.dtype)


def _round_up(a, b):
    return (a + b - 1) // b * b


def _cdiv(a, b):
    return (a + b - 1) // b


_MXU_MIN_D = 5                       # D <= 4 -> unrolled VPU path
_VMEM_INPUT_BUDGET = 12 * 1024 * 1024
_VMEM_LIMIT_CAP = 48 * 1024 * 1024   # v7x-safe (64 MiB physical per TC)


@functools.partial(
    jax.jit,
    static_argnames=("diag", "return_distance", "tn", "tm", "out_dtype"))
def rbf_forward(X, Z, sigma, lengthscale, diag=False, return_distance=False,
                tn=512, tm=2048, out_dtype=jnp.float32):
    sigma = jnp.asarray(sigma, jnp.float32)
    lengthscale = jnp.asarray(lengthscale, jnp.float32)

    if diag:
        # RBF.forward(diag=True): (sigma ** 2).expand(X.size(0))
        return jnp.broadcast_to(sigma ** 2, (X.shape[0],)).astype(out_dtype)

    N, D = X.shape
    M, Dz = Z.shape
    assert D == Dz, "X and Z feature dims must match"

    # --- tile selection -----------------------------------------------------
    # Clamp to (rounded-up) problem size; tn multiple of 8 (sublane),
    # tm multiple of 128 (lane-dense stores).
    tn = min(tn, _round_up(N, 8))
    tm = min(tm, _round_up(M, 128))

    # Keep the D-dependent input double-buffers bounded for large feature dims
    # so we never overrun v7x's 64 MiB VMEM.
    while 2 * 4 * D * tm > _VMEM_INPUT_BUDGET and tm > 128:
        tm = max(128, _round_up(tm // 2, 128))
    while 2 * 4 * D * tn > _VMEM_INPUT_BUDGET and tn > 8:
        tn = max(8, _round_up(tn // 2, 8))

    # Megacore guard: keep >= 2 tiles along one "parallel" axis when possible
    # so both v7x TensorCores get work.
    if _cdiv(N, tn) * _cdiv(M, tm) < 2:
        if M > 128:
            tm = _round_up(_cdiv(M, 2), 128)
        elif N > 8:
            tn = _round_up(_cdiv(N, 2), 8)

    grid = (_cdiv(N, tn), _cdiv(M, tm))

    # --- inputs (native dtype, no pad; only Z transposed so tm sits in lanes)
    Zt = Z.T                                          # (D, M)

    # Hoisted scalar math, delivered via scalar prefetch (SMEM).
    params = jnp.stack(
        [-0.5 / (lengthscale * lengthscale), jnp.log(sigma * sigma)]
    ).astype(jnp.float32)

    use_mxu = D >= _MXU_MIN_D
    n_out = 1 + int(return_distance)

    out_shapes = [jax.ShapeDtypeStruct((N, M), out_dtype)]
    out_specs = [pl.BlockSpec((tn, tm), lambda i, j, p: (i, j))]
    if return_distance:
        out_shapes.append(jax.ShapeDtypeStruct((N, M), jnp.float32))
        out_specs.append(pl.BlockSpec((tn, tm), lambda i, j, p: (i, j)))

    out_itemsize = jnp.dtype(out_dtype).itemsize
    cost = pl.CostEstimate(
        flops=(2 * D + 6) * N * M,
        transcendentals=n_out * N * M,                 # exp (+ sqrt)
        bytes_accessed=4 * (N * D + D * M)
        + N * M * (out_itemsize + (4 if return_distance else 0)),
    )

    # VMEM: double-buffered inputs + double-buffered outputs + headroom,
    # capped for the v7x 64-MiB-per-TC budget.
    vmem_need = (2 * 4 * (tn * D + D * tm)
                 + 2 * tn * tm * (out_itemsize + (4 if return_distance else 0)))
    vmem_limit = int(min(max(vmem_need + (8 << 20), 32 << 20), _VMEM_LIMIT_CAP))

    outs = pl.pallas_call(
        functools.partial(_rbf_kernel, emit_dist=return_distance,
                          use_mxu=use_mxu),
        out_shape=tuple(out_shapes),
        grid_spec=pltpu.PrefetchScalarGridSpec(
            num_scalar_prefetch=1,
            grid=grid,
            in_specs=[pl.BlockSpec((tn, D), lambda i, j, p: (i, 0)),
                      pl.BlockSpec((D, tm), lambda i, j, p: (0, j))],
            out_specs=tuple(out_specs)),
        compiler_params=pltpu.CompilerParams(
            dimension_semantics=("parallel", "parallel"),
            vmem_limit_bytes=vmem_limit),
        cost_estimate=cost,
    )(params, X, Zt)

    if return_distance:
        return outs[0], outs[1]
    return outs[0]


def _rbf_reference(X, Z, sigma, lengthscale):
    d2 = jnp.sum((X[:, None, :] - Z[None, :, :]) ** 2, axis=-1)
    dist = jnp.sqrt(jnp.maximum(d2, 0.0))
    return sigma ** 2 * jnp.exp(-0.5 * d2 / lengthscale ** 2), dist


if __name__ == "__main__":
    # Deterministic params as in RBF.__init__
    sigma = jnp.float32(1.0)
    lengthscale = jnp.float32(2.0)

    key = jax.random.PRNGKey(0)
    kx, kz, kx2, kz2 = jax.random.split(key, 4)

    # input_dim = 2 -> feature dim 2 (tiny-D VPU path)
    N, M, D = 64, 128, 2
    X = jax.random.normal(kx, (N, D), dtype=jnp.float32)
    Z = jax.random.normal(kz, (M, D), dtype=jnp.float32)

    # K-only path (no distance output, no sqrt)
    K = jax.block_until_ready(rbf_forward(X, Z, sigma, lengthscale))
    K_ref, dist_ref = _rbf_reference(X, Z, sigma, lengthscale)
    assert K.shape == (N, M)
    assert jnp.allclose(K, K_ref, atol=1e-5, rtol=1e-4)

    # return_distance path
    K2, dist = rbf_forward(X, Z, sigma, lengthscale, return_distance=True)
    K2 = jax.block_until_ready(K2)
    dist = jax.block_until_ready(dist)
    assert jnp.allclose(K2, K_ref, atol=1e-5, rtol=1e-4)
    assert jnp.allclose(dist, dist_ref, atol=1e-4, rtol=1e-4)

    # Ragged shapes + larger D (MXU Gram path + masked edge stores, no pad/slice)
    N2, M2, D2 = 100, 200, 16
    X2 = jax.random.normal(kx2, (N2, D2), dtype=jnp.float32)
    Z2 = jax.random.normal(kz2, (M2, D2), dtype=jnp.float32)
    K3, dist3 = rbf_forward(X2, Z2, sigma, lengthscale, return_distance=True)
    K3 = jax.block_until_ready(K3)
    dist3 = jax.block_until_ready(dist3)
    K3_ref, dist3_ref = _rbf_reference(X2, Z2, sigma, lengthscale)
    assert K3.shape == (N2, M2)
    assert jnp.allclose(K3, K3_ref, atol=1e-5, rtol=1e-4)
    assert jnp.allclose(dist3, dist3_ref, atol=1e-4, rtol=1e-4)

    # Non-trivial sigma / lengthscale (exercises the folded exponent)
    s2, l2 = jnp.float32(1.5), jnp.float32(0.7)
    K4 = jax.block_until_ready(rbf_forward(X2, Z2, s2, l2))
    K4_ref, _ = _rbf_reference(X2, Z2, s2, l2)
    assert jnp.allclose(K4, K4_ref, atol=1e-5, rtol=1e-4)

    # diag path (plain broadcasting, no kernel needed)
    d = jax.block_until_ready(rbf_forward(X, Z, sigma, lengthscale, diag=True))
    assert d.shape == (N,) and jnp.allclose(d, sigma ** 2)

    print("KERNEL_OK")
</pallas_src>

<mosaic_0001>
module attributes {stable_mosaic.version = 11 : i64} {
  func.func @_rbf_kernel(%arg0: i32, %arg1: i32, %arg2: memref<2xf32, #tpu.memory_space<smem>>, %arg3: memref<32x2xf32, #tpu.memory_space<vmem>>, %arg4: memref<2x128xf32, #tpu.memory_space<vmem>>, %arg5: memref<32x128xf32, #tpu.memory_space<vmem>>) attributes {dimension_semantics = [#tpu.dimension_semantics<parallel>, #tpu.dimension_semantics<parallel>], iteration_bounds = array<i64: 2, 1>, scalar_prefetch = 1 : i64, scratch_operands = 0 : i64, tpu.core_type = #tpu.core_type<tc>, window_params = [{transform_indices = @transform_0, window_bounds = array<i64: 32, 2>}, {transform_indices = @transform_1, window_bounds = array<i64: 2, 128>}, {transform_indices = @transform_2, window_bounds = array<i64: 32, 128>}]} {
    %c0 = arith.constant 0 : index
    %c0_0 = arith.constant 0 : index
    %0 = vector.load %arg3[%c0, %c0_0] : memref<32x2xf32, #tpu.memory_space<vmem>>, vector<32x2xf32>
    %c0_1 = arith.constant 0 : index
    %c0_2 = arith.constant 0 : index
    %1 = vector.load %arg4[%c0_1, %c0_2] : memref<2x128xf32, #tpu.memory_space<vmem>>, vector<2x128xf32>
    %cst = arith.constant 0.000000e+00 : f32
    %2 = vector.broadcast %cst : f32 to vector<32x128xf32>
    %3 = vector.extract_strided_slice %0 {offsets = [0, 0], sizes = [32, 1], strides = [1, 1]} : vector<32x2xf32> to vector<32x1xf32>
    %4 = vector.extract_strided_slice %1 {offsets = [0, 0], sizes = [1, 128], strides = [1, 1]} : vector<2x128xf32> to vector<1x128xf32>
    %5 = vector.broadcast %3 : vector<32x1xf32> to vector<32x128xf32>
    %6 = vector.broadcast %4 : vector<1x128xf32> to vector<32x128xf32>
    %7 = arith.subf %5, %6 : vector<32x128xf32>
    %8 = arith.mulf %7, %7 : vector<32x128xf32>
    %9 = arith.addf %2, %8 : vector<32x128xf32>
    %10 = vector.extract_strided_slice %0 {offsets = [0, 1], sizes = [32, 1], strides = [1, 1]} : vector<32x2xf32> to vector<32x1xf32>
    %11 = vector.extract_strided_slice %1 {offsets = [1, 0], sizes = [1, 128], strides = [1, 1]} : vector<2x128xf32> to vector<1x128xf32>
    %12 = vector.broadcast %10 : vector<32x1xf32> to vector<32x128xf32>
    %13 = vector.broadcast %11 : vector<1x128xf32> to vector<32x128xf32>
    %14 = arith.subf %12, %13 : vector<32x128xf32>
    %15 = arith.mulf %14, %14 : vector<32x128xf32>
    %16 = arith.addf %9, %15 : vector<32x128xf32>
    %c0_3 = arith.constant 0 : index
    %17 = memref.load %arg2[%c0_3] : memref<2xf32, #tpu.memory_space<smem>>
    %c1 = arith.constant 1 : index
    %18 = memref.load %arg2[%c1] : memref<2xf32, #tpu.memory_space<smem>>
    %19 = vector.broadcast %17 : f32 to vector<32x128xf32>
    %20 = arith.mulf %16, %19 : vector<32x128xf32>
    %21 = vector.broadcast %18 : f32 to vector<32x128xf32>
    %22 = arith.addf %20, %21 : vector<32x128xf32>
    %23 = math.exp %22 : vector<32x128xf32>
    %c0_4 = arith.constant 0 : index
    %c0_5 = arith.constant 0 : index
    %24 = vector.load %arg5[%c0_4, %c0_5] : memref<32x128xf32, #tpu.memory_space<vmem>>, vector<32x128xf32>
    tpu.vector_store %arg5[%c0_4, %c0_5], %23 {strides = array<i32>} : memref<32x128xf32, #tpu.memory_space<vmem>>, vector<32x128xf32>,
    return
  }
  func.func @transform_0(%arg0: i32, %arg1: i32, %arg2: memref<2xf32, #tpu.memory_space<smem>>) -> (i32, i32) {
    %c0_i32 = arith.constant 0 : i32
    %c0_i32_0 = arith.constant 0 : i32
    return %arg0, %c0_i32 : i32, i32
  }
  func.func @transform_1(%arg0: i32, %arg1: i32, %arg2: memref<2xf32, #tpu.memory_space<smem>>) -> (i32, i32) {
    %c0_i32 = arith.constant 0 : i32
    %c0_i32_0 = arith.constant 0 : i32
    return %c0_i32, %arg1 : i32, i32
  }
  func.func @transform_2(%arg0: i32, %arg1: i32, %arg2: memref<2xf32, #tpu.memory_space<smem>>) -> (i32, i32) {
    %c0_i32 = arith.constant 0 : i32
    return %arg0, %arg1 : i32, i32
  }
}

</mosaic_0001>

<bundles_post_ra>
// kernel: rbf_forward.1
= control target key start
LH: loop header
LB: loop body
LE: loop exit
PB: predicated region body
PF: predicated region fallthrough
CT: control target
= control target key end

     0   :  { %s710_s0 = inlined_call_operand.vmem [shape: f32[2], index: 0, kind: input, shape index: {}]   ;;  %s711_s1 = inlined_call_operand.vmem [shape: f32[64,2], index: 1, kind: input, shape index: {}]   ;;  %s712_s2 = inlined_call_operand.vmem [shape: f32[2,128], index: 2, kind: input, shape index: {}]   ;;  %s713_s3 = inlined_call_operand.hbm [shape: f32[64,128], index: 3, kind: output, shape index: {}]  }
   0x1   :  { %s8_s14 = sshll.u32 %s710_s0, 4  ;;  %s9_s14 = int_to_ptr.vmem [resolvable:$true] %s8_s14 }
   0x2   :  { %s470_s15 = scalar_lea.vmem %s9_s14, 16  ;;  %p475_p1 = scmp.lt.s32.totalorder %s9_s14, %s9_s14 }
   0x3   :  { %p471_p0 = scmp.ne.s32.totalorder %s9_s14, %s470_s15  ;;  %p476_p2 = scmp.lt.s32.totalorder %s470_s15, %s470_s15 }
   0x5   :  { %p477_p3 = por %p476_p2, %p475_p1 }
   0x7   :  { %p478_p4 = pnand %p477_p3, %p471_p0 }
   0x9   :  { %481 = shalt.err (!%p478_p4)  }
   0xa   :  { %s564_s16 = smov [#allocation3]  }
   0xb   :  { %11 = dma.vmem_to_smem %s9_s14, 16, %s564_s16, [#allocation2] }
   0xc   :  { %534 = dma.done.wait [#allocation2], 16 }
   0xd   :  { %535 = vsyncadd [#allocation2], 4294967280 }
   0xe   :  { %13 = sfence }
   0xf   :  { %14 = vsyncpa [#allocation5], 0 }
  0x10   :  { %16 = vsyncpa [#allocation5 + $0x1], 0  ;;  %s593_s17 = smov 0   ;;  %s595_s18 = smov 0  }
  0x11   :  { %s597_s0 = smov 0   ;;  %s599_s19 = smov 0  }
  0x12   :  { %s601_s20 = smov 0   ;;  %s603_s21 = smov 0  }
  0x13 LB: > { %s382_s22 = sadd.s32 4294967295, %s562_s21   ;;  %s383_s23 = sadd.s32 4294967294, %s562_s21   ;;  %s562_s21 = sphi %s603_s21, %s22_s21   ;;  %s558_s20 = sphi %s601_s20, %s720_s20   ;;  %s554_s19 = sphi %s599_s19, %s719_s19   ;;  %s550_s0 = sphi %s597_s0, %s718_s0   ;;  %s546_s18 = sphi %s595_s18, %s717_s18   ;;  %s542_s17 = sphi %s593_s17, %s716_s17  }
  0x14   : > { %s34_s24 = sadd.s32 1, %s558_s20  ;;  %s95_s25 = sadd.s32 1, %s550_s0 }
  0x15   : > { %p36_p5 = scmp.ge.s32.totalorder %s34_s24, 2  ;;  %p105_p6 = scmp.ne.s32.totalorder %s550_s0, %s546_s18 }
  0x16   : > { %p106_p7 = scmp.eq.s32.totalorder %s382_s22, 1  ;;  %p111_p8 = scmp.ne.s32.totalorder %s546_s18, %s542_s17 }
  0x17   : > { %s722_s24 = smov (%p36_p5, %s34_s24), 0  ;;  %p112_p10 = scmp.eq.s32.totalorder %s383_s23, 1 }
  0x18   : > { %p633_p9 = por %p106_p7, %p105_p6  ;;  %s90_s27 = ssub.s32 %s558_s20, %s722_s24 }
  0x19   : > { %p387_p11 = scmp.ge.s32.totalorder %s562_s21, 1  ;;  %p93_p12 = scmp.eq.s32.totalorder %s90_s27, 0 }
  0x1a   : > { %p640_p13 = por %p112_p10, %p111_p8  ;;  %p146_p0 = scmp.lt.s32.totalorder %s562_s21, 3 }
  0x1b   : > { %s646_s29 = scalar_select %p93_p12, %s550_s0, %s95_s25  }
  0x1c   : > { %p147_p1 = pnand %p387_p11, %p146_p0 }
  0x1d   : > { %s389_s30 = sshll.u32 (!%p147_p1), %s554_s19, 2  ;;  %v565_v0 = vmov (!%p147_p1), 0   ;;  %v566_v5 = vmov (!%p147_p1), 1   ;;  %v208_v6 = vlaneseq (!%p147_p1)  ;;  %v187_v11 = vld [vmem:[%s712_s2] sm:$0x3] (!%p147_p1)  ;;  %s256_s10 = sld [smem:[#allocation3]] (!%p147_p1) }
  0x1e   : > { %150 = sbr.rel (%p147_p1) target bundleno = 221 (0xdd), region = 28  ;;  %459 = vset.pattern.permute.xlu1 (!%p147_p1), %v565_v0  ;;  %458 = vset.pattern.permute.xlu0 (!%p147_p1), %v565_v0  ;;  %p173_p2 = scmp.lt.s32.totalorder (!%p147_p1), %s389_s30, 7 }
  0x1f   : > { %v209_v7 = vshrl.u32 (!%p147_p1), %v208_v6, 7  ;;  %s391_s11 = sld [smem:[#allocation3 + $0x1]] (!%p147_p1)  ;;  %s169_s12 = sand.u32 (!%p147_p1), 1, %s546_s18  }
  0x20   : > { %s388_s13 = sshll.u32 (!%p147_p1), %s169_s12, 5  ;;  %s397_s14 = sshll.u32 (!%p147_p1), %s554_s19, 9 }
  0x21   : > { %v210_v8 = vsub.s32 (!%p147_p1), 0, %v209_v7  ;;  %v242_v12 = vsub.s32 (!%p147_p1), 1, %v209_v7  ;;  %s171_s15 = scalar_lea.vmem (!%p147_p1), [#allocation4], %s388_s13  ;;  %s660_s25 = scalar_lea.hbm (!%p147_p1), %s713_s3, %s397_s14 }
  0x22   : > { %s295_s16 = sshll.u32 (!%p147_p1), %s171_s15, 4  ;;  %s664_s19 = scalar_lea.sflag (!%p147_p1), [#allocation5], %s169_s12  ;;  %s662_s16 = int_to_ptr.vmem [resolvable:$true] %s295_s16 }
  0x23   : > { %v211_v13 = vrot.slane (!%p147_p1), %v187_v11, %v210_v8  ;;  %v243_v16 = vrot.slane (!%p147_p1), %v187_v11, %v242_v12  ;;  %v258_v29 = vstv (!%p147_p1), %s256_s10  ;;  %s482_s27 = scalar_lea.vmem (!%p147_p1), %s662_s16, 512 }
  0x24   : > { %p483_p3 = scmp.ne.s32.totalorder (!%p147_p1), %s662_s16, %s482_s27 }
  0x25   : > { %s724_s30 = smov (!%p173_p2, %s389_s30), 7  ;;  %v263_v38 = vstv %s391_s11 }
  0x26   : > { %s390_s4 = sshll.u32 %s724_s30, 3  ;;  %p484_p4 = pnand %p483_p3, %p633_p9 }
  0x27   : > { %s176_s7 = scalar_lea.vmem %s711_s1, %s390_s4  ;;  %s567_s30 = smov [#allocation4]  }
  0x28   : > { %v185_v1 = vld [vmem:[%s176_s7 + $0x10] sm:$0xff]  ;;  %v183_v2 = vld [vmem:[%s176_s7] sm:$0xff]  ;;  %v186_v3 = vld [vmem:[%s176_s7 + $0x18] sm:$0xff]  ;;  %p485_p5 = pneg %p484_p4  ;;  %s486_s4 = sshll.u32 %s567_s30, 4  ;;  %s487_s4 = int_to_ptr.vmem [resolvable:$false] %s486_s4 }
  0x29   : > { %200 = vperm.xlu1 %459, %v185_v1   ;;  %190 = vperm.xlu0 %458, %v183_v2   ;;  %v184_v4 = vld [vmem:[%s176_s7 + $0x8] sm:$0xff]  ;;  %s488_s5 = scalar_lea.vmem %s487_s4, 1024  ;;  %p489_p6 = scmp.lt.s32.totalorder %s662_s16, %s487_s4 }
  0x2a   : > { %p490_p7 = scmp.lt.s32.totalorder %s488_s5, %s482_s27 }
  0x2c   : > { %p491_p8 = por %p490_p7, %p489_p6 }
  0x2d   : > { %205 = vperm.xlu1 %459, %v186_v3   ;;  %195 = vperm.xlu0 %458, %v184_v4  }
  0x2e   : > { %p492_p10 = pnand %p491_p8, %p485_p5 }
  0x31   : > { %461 = vset.pattern.permute.xlu1 %v566_v5  ;;  %460 = vset.pattern.permute.xlu0 %v566_v5 }
  0x32   : > { %229 = vperm.xlu1 %461, %v184_v4   ;;  %225 = vperm.xlu0 %460, %v183_v2  }
  0x36   : > { %233 = vperm.xlu1 %461, %v185_v1   ;;  %237 = vperm.xlu0 %460, %v186_v3  }
  0xa8   : > { %v201_v9 = vpop.permute.xlu1 %200  ;;  %v191_v10 = vpop.permute.xlu0 %190 }
  0xa9   : > { %v212_v17 = vsub.f32 %v191_v10, %v211_v13  ;;  %v214_v23 = vsub.f32 %v201_v9, %v211_v13 }
  0xab   : > { %v216_v25 = vmul.f32 %v212_v17, %v212_v17  ;;  %v218_v36 = vmul.f32 %v214_v23, %v214_v23 }
  0xac   : > { %v206_v14 = vpop.permute.xlu1 %205  ;;  %v196_v15 = vpop.permute.xlu0 %195 }
  0xad   : > { %v213_v18 = vsub.f32 %v196_v15, %v211_v13  ;;  %v215_v24 = vsub.f32 %v206_v14, %v211_v13 }
  0xaf   : > { %v217_v26 = vmul.f32 %v213_v18, %v213_v18  ;;  %v219_v37 = vmul.f32 %v215_v24, %v215_v24 }
  0xb1   : > { %v230_v19 = vpop.permute.xlu1 %229  ;;  %v226_v20 = vpop.permute.xlu0 %225 }
  0xb2   : > { %v245_v21 = vsub.f32 %v230_v19, %v243_v16  ;;  %v244_v22 = vsub.f32 %v226_v20, %v243_v16 }
  0xb4   : > { %v249_v27 = vmul.f32 %v245_v21, %v245_v21  ;;  %v248_v28 = vmul.f32 %v244_v22, %v244_v22 }
  0xb5   : > { %v234_v30 = vpop.permute.xlu1 %233  ;;  %v238_v31 = vpop.permute.xlu0 %237 }
  0xb6   : > { %v253_v32 = vadd.f32 %v249_v27, %v217_v26  ;;  %v252_v33 = vadd.f32 %v248_v28, %v216_v25  ;;  %v246_v34 = vsub.f32 %v234_v30, %v243_v16  ;;  %v247_v35 = vsub.f32 %v238_v31, %v243_v16 }
  0xb8   : > { %v260_v39 = vmul.f32 %v258_v29, %v253_v32  ;;  %v259_v40 = vmul.f32 %v258_v29, %v252_v33  ;;  %v250_v41 = vmul.f32 %v246_v34, %v246_v34  ;;  %v251_v42 = vmul.f32 %v247_v35, %v247_v35 }
  0xba   : > { %v265_v43 = vadd.f32 %v263_v38, %v260_v39  ;;  %v264_v44 = vadd.f32 %v263_v38, %v259_v40  ;;  %v254_v45 = vadd.f32 %v250_v41, %v218_v36  ;;  %v255_v46 = vadd.f32 %v251_v42, %v219_v37 }
  0xbc   : > { %v270_v47 = vmul.f32 1.442695, %v265_v43  ;;  %v268_v48 = vmul.f32 1.442695, %v264_v44  ;;  %v261_v49 = vmul.f32 %v258_v29, %v254_v45  ;;  %v262_v50 = vmul.f32 %v258_v29, %v255_v46 }
  0xbe   : > { %462 = vpow2.f32 %v270_v47  ;;  %v266_v51 = vadd.f32 %v263_v38, %v261_v49  ;;  %v267_v52 = vadd.f32 %v263_v38, %v262_v50 }
  0xbf   : > { %464 = vpow2.f32 %v268_v48 }
  0xc0   : > { %v272_v53 = vmul.f32 1.442695, %v266_v51  ;;  %v274_v54 = vmul.f32 1.442695, %v267_v52 }
  0xc2   : > { %466 = vpow2.f32 %v272_v53 }
  0xc3   : > { %468 = vpow2.f32 %v274_v54 }
  0xc8   : > { %v463_v55 = vpop.eup %462 }
  0xc9   : > { %v465_v56 = vpop.eup %464  ;;  %277 = vst [vmem:[%s171_s15 + $0x8] sm:$0xff] %v463_v55 }
  0xca   : > { %276 = vst [vmem:[%s171_s15] sm:$0xff] %v465_v56 }
  0xcc   : > { %v467_v57 = vpop.eup %466 }
  0xcd   : > { %v469_v58 = vpop.eup %468  ;;  %278 = vst [vmem:[%s171_s15 + $0x10] sm:$0xff] %v467_v57 }
  0xce   : > { %279 = vst [vmem:[%s171_s15 + $0x18] sm:$0xff] %v469_v58 }
  0xcf   : > { %495 = shalt.err (!%p492_p10)
}
  0xd0   : > { %s496_s6 = scalar_lea.hbm %s660_s25, 512  ;;  %s500_s9 = scalar_lea.hbm %s713_s3, 1024 }
  0xd1   : > { %p497_p11 = scmp.ne.s32.totalorder %s660_s25, %s496_s6  ;;  %p501_p1 = scmp.lt.u32.totalorder %s660_s25, %s713_s3 }
  0xd2   : > { %p502_p2 = scmp.lt.u32.totalorder %s500_s9, %s496_s6  ;;  %p504_p4 = scmp.lt.u32.totalorder %s496_s6, %s660_s25 }
  0xd3   : > { %p498_p12 = pnand %p497_p11, %p633_p9 }
  0xd4   : > { %p503_p3 = por %p502_p2, %p501_p1 }
  0xd5   : > { %p499_p0 = pneg %p498_p12 }
  0xd6   : > { %p505_p5 = por %p504_p4, %p503_p3 }
  0xd8   : > { %p506_p6 = pnand %p505_p5, %p499_p0 }
  0xda   : > { %509 = shalt.err (!%p506_p6)
}
  0xdb   : > { %s568_s12 = smov 128   ;;  %s569_s13 = smov 8  }
  0xdc   : > { %398 = dma.vmem_to_hbm [thread:$0]  (%p633_p9), %s662_s16, 512, %s660_s25, %s664_s19, %s568_s12, %s568_s12, %s569_s13  }
  0xdd PF: > { %p404_p7 = scmp.ge.s32.totalorder %s562_s21, 2  ;;  %s310_s14 = sand.u32 1, %s542_s17  }
  0xde   : > { %s311_s15 = scalar_lea.sflag [#allocation5], %s310_s14 }
  0xdf   : > { %p401_p8 = pnand %p404_p7, %p640_p13 }
  0xe1   : > { %537 = dma.done.wait (!%p401_p8), %s311_s15, 512  }
  0xe2   : > { %539 = vsyncadd (!%p401_p8), %s311_s15, 4294966784  ;;  %s22_s21 = sadd.s32 1, %s562_s21   ;;  %s716_s17 = smov %s546_s18 }
  0xe3   : > { %p19_p10 = scmp.ge.s32.totalorder %s22_s21, 4   ;;  %s717_s18 = smov %s550_s0 }
  0xe4   : > { %s718_s0 = smov %s646_s29  ;;  %s719_s19 = smov %s558_s20 }
  0xe5   : > { %s720_s20 = smov %s722_s24  ;;  %21 = sbr.rel (!%p19_p10) target bundleno = 19 (0x13), region = 66 }
  0xec   :  { %316 = vsyncpa [#allocation5], 1 }
  0xed   :  { %318 = vsyncpa [#allocation5 + $0x1], 1 }

</bundles_post_ra>
